<compile_context>
chip_gen: v7x
topology: tpu7x:2x2x1
jax: 0.10.0
libtpu: 0.0.40
codegen_flags: <defaults>
</compile_context>

<pallas_src>
import jax
import jax.numpy as jnp
from jax.experimental import pallas as pl
from jax.experimental.pallas import tpu as pltpu

NEG_SLOPE = 0.01   # F.leaky_relu default negative_slope
NUM_ACTIONS = 2


def _leaky_relu(x):
    return jnp.where(x > 0, x, NEG_SLOPE * x)


def actor_kernel(x_ref, w1_ref, b1_ref, w2_ref, b2_ref, w3d_ref, b3d_ref, out_ref):
    # x may be stored as bf16 for HBM-bandwidth savings; compute in f32.
    x = x_ref[...].astype(jnp.float32)

    # fc1 + leaky_relu  (MXU matmul, f32 accumulate)
    h1 = jnp.dot(x, w1_ref[...], preferred_element_type=jnp.float32) + b1_ref[...]
    h1 = _leaky_relu(h1)

    # fc2 + leaky_relu
    h2 = jnp.dot(h1, w2_ref[...], preferred_element_type=jnp.float32) + b2_ref[...]
    h2 = _leaky_relu(h2)

    # action_head reduced to logit difference d = l1 - l0  -> (TB, 1)
    d = jnp.dot(h2, w3d_ref[...], preferred_element_type=jnp.float32) + b3d_ref[...]

    # 2-class softmax == sigmoid of the logit difference (EUP exp, no XLU)
    p1 = 1.0 / (1.0 + jnp.exp(-d))       # prob of class 1
    p0 = 1.0 - p1                        # prob of class 0 (rows sum to exactly 1)

    # (TB, 2) store: column 0 -> p0, column 1 -> p1.
    lane = jax.lax.broadcasted_iota(jnp.int32, out_ref.shape, 1)
    out_ref[...] = jnp.where(lane == 0, p0, p1)


def actor_forward(x, params, *, block_b=2048, store_x_bf16=False):
    """x: (B, num_state) float32 -> action_prob: (B, 2) float32."""
    w1, b1, w2, b2, w3, b3 = params
    B, num_state = x.shape

    # Logit-difference reformulation of the 2-class softmax (done once in XLA).
    w3d = w3[:, 1:2] - w3[:, 0:1]        # (16, 1)
    b3d = b3[:, 1:2] - b3[:, 0:1]        # (1, 1)

    # Batch tile: multiple of 8 sublanes, capped by the (padded) batch size.
    b_rounded = -(-B // 8) * 8
    TB = min(block_b, b_rounded)
    Bp = -(-B // TB) * TB                # pad batch to a multiple of TB
    if Bp != B:
        x = jnp.pad(x, ((0, Bp - B), (0, 0)))

    if store_x_bf16:
        # Halves HBM traffic for x (v6e/v7x lever); compute stays f32 in-kernel.
        x = x.astype(jnp.bfloat16)

    resident = lambda a: pl.BlockSpec(a.shape, lambda i: (0, 0))

    out_padded = pl.pallas_call(
        actor_kernel,
        out_shape=jax.ShapeDtypeStruct((Bp, NUM_ACTIONS), jnp.float32),
        grid=(Bp // TB,),
        in_specs=[
            pl.BlockSpec((TB, num_state), lambda i: (i, 0)),   # x: batch-tiled
            resident(w1), resident(b1),
            resident(w2), resident(b2),
            resident(w3d), resident(b3d),
        ],
        out_specs=pl.BlockSpec((TB, NUM_ACTIONS), lambda i: (i, 0)),
        compiler_params=pltpu.CompilerParams(
            dimension_semantics=("parallel",)),
    )(x, w1, b1, w2, b2, w3d, b3d)

    return out_padded[:B] if Bp != B else out_padded


def init_params(key, num_state):
    """Deterministic init mimicking PyTorch nn.Linear's U(-1/sqrt(in), 1/sqrt(in))."""
    dims = [(num_state, 64), (64, 16), (16, 2)]
    params = []
    for (fan_in, fan_out) in dims:
        key, kw, kb = jax.random.split(key, 3)
        bound = 1.0 / jnp.sqrt(jnp.float32(fan_in))
        w = jax.random.uniform(kw, (fan_in, fan_out), jnp.float32, -bound, bound)
        b = jax.random.uniform(kb, (1, fan_out), jnp.float32, -bound, bound)
        params += [w, b]
    return tuple(params)


def _reference_forward(x, params):
    """Pure-JAX reference (f32) for correctness check."""
    w1, b1, w2, b2, w3, b3 = params
    h1 = _leaky_relu(x @ w1 + b1)
    h2 = _leaky_relu(h1 @ w2 + b2)
    logits = h2 @ w3 + b3
    return jax.nn.softmax(logits, axis=1)


if __name__ == "__main__":
    # num_state = env.f_node + env.f_task -> synthetic small value
    num_state = 32
    batch = 8

    key = jax.random.PRNGKey(0)
    key, kx = jax.random.split(key)
    x = jax.random.normal(kx, (batch, num_state), jnp.float32)

    params = init_params(key, num_state)

    action_prob = actor_forward(x, params)
    action_prob = jax.block_until_ready(action_prob)

    # sanity: shape, rows sum to ~1, matches pure-JAX softmax reference
    assert action_prob.shape == (batch, 2)
    row_sums = jnp.sum(action_prob, axis=1)
    assert bool(jnp.all(jnp.abs(row_sums - 1.0) < 1e-5))
    ref = _reference_forward(x, params)
    assert bool(jnp.all(jnp.abs(action_prob - ref) < 1e-5))

    print("KERNEL_OK")
</pallas_src>

<mosaic_0001>
module attributes {stable_mosaic.version = 11 : i64} {
  func.func @actor_kernel(%arg0: i32, %arg1: memref<8x32xf32, #tpu.memory_space<vmem>>, %arg2: memref<32x64xf32, #tpu.memory_space<vmem>>, %arg3: memref<1x64xf32, #tpu.memory_space<vmem>>, %arg4: memref<64x16xf32, #tpu.memory_space<vmem>>, %arg5: memref<1x16xf32, #tpu.memory_space<vmem>>, %arg6: memref<16x1xf32, #tpu.memory_space<vmem>>, %arg7: memref<1x1xf32, #tpu.memory_space<vmem>>, %arg8: memref<8x2xf32, #tpu.memory_space<vmem>>) attributes {dimension_semantics = [#tpu.dimension_semantics<parallel>], iteration_bounds = array<i64: 1>, scalar_prefetch = 0 : i64, scratch_operands = 0 : i64, tpu.core_type = #tpu.core_type<tc>, window_params = [{transform_indices = @transform_0, window_bounds = array<i64: 8, 32>}, {pipeline_mode = #tpu.pipeline_mode<synchronous>, transform_indices = @transform_1, window_bounds = array<i64: 32, 64>}, {pipeline_mode = #tpu.pipeline_mode<synchronous>, transform_indices = @transform_2, window_bounds = array<i64: 1, 64>}, {pipeline_mode = #tpu.pipeline_mode<synchronous>, transform_indices = @transform_3, window_bounds = array<i64: 64, 16>}, {pipeline_mode = #tpu.pipeline_mode<synchronous>, transform_indices = @transform_4, window_bounds = array<i64: 1, 16>}, {pipeline_mode = #tpu.pipeline_mode<synchronous>, transform_indices = @transform_5, window_bounds = array<i64: 16, 1>}, {pipeline_mode = #tpu.pipeline_mode<synchronous>, transform_indices = @transform_6, window_bounds = array<i64: 1, 1>}, {transform_indices = @transform_7, window_bounds = array<i64: 8, 2>}]} {
    %c0 = arith.constant 0 : index
    %c0_0 = arith.constant 0 : index
    %0 = vector.load %arg1[%c0, %c0_0] : memref<8x32xf32, #tpu.memory_space<vmem>>, vector<8x32xf32>
    %c0_1 = arith.constant 0 : index
    %c0_2 = arith.constant 0 : index
    %1 = vector.load %arg2[%c0_1, %c0_2] : memref<32x64xf32, #tpu.memory_space<vmem>>, vector<32x64xf32>
    %cst = arith.constant dense<0.000000e+00> : vector<8x64xf32>
    %2 = tpu.matmul %0, %1, %cst {dimension_numbers = #tpu.dot_dimension_numbers<[1], [0], [0], [1], [0, 0, 1, 1], [], []>} : vector<8x32xf32>, vector<32x64xf32>, vector<8x64xf32> -> vector<8x64xf32>
    %c0_3 = arith.constant 0 : index
    %c0_4 = arith.constant 0 : index
    %3 = vector.load %arg3[%c0_3, %c0_4] : memref<1x64xf32, #tpu.memory_space<vmem>>, vector<1x64xf32>
    %4 = vector.broadcast %3 : vector<1x64xf32> to vector<8x64xf32>
    %5 = arith.addf %2, %4 : vector<8x64xf32>
    %cst_5 = arith.constant 0.000000e+00 : f32
    %6 = vector.broadcast %cst_5 : f32 to vector<8x64xf32>
    %7 = arith.cmpf ogt, %5, %6 : vector<8x64xf32>
    %cst_6 = arith.constant 0.00999999977 : f32
    %8 = vector.broadcast %cst_6 : f32 to vector<8x64xf32>
    %9 = arith.mulf %8, %5 : vector<8x64xf32>
    %10 = arith.select %7, %5, %9 : vector<8x64xi1>, vector<8x64xf32>
    %c0_7 = arith.constant 0 : index
    %c0_8 = arith.constant 0 : index
    %11 = vector.load %arg4[%c0_7, %c0_8] : memref<64x16xf32, #tpu.memory_space<vmem>>, vector<64x16xf32>
    %cst_9 = arith.constant dense<0.000000e+00> : vector<8x16xf32>
    %12 = tpu.matmul %10, %11, %cst_9 {dimension_numbers = #tpu.dot_dimension_numbers<[1], [0], [0], [1], [0, 0, 1, 1], [], []>} : vector<8x64xf32>, vector<64x16xf32>, vector<8x16xf32> -> vector<8x16xf32>
    %c0_10 = arith.constant 0 : index
    %c0_11 = arith.constant 0 : index
    %13 = vector.load %arg5[%c0_10, %c0_11] : memref<1x16xf32, #tpu.memory_space<vmem>>, vector<1x16xf32>
    %14 = vector.broadcast %13 : vector<1x16xf32> to vector<8x16xf32>
    %15 = arith.addf %12, %14 : vector<8x16xf32>
    %cst_12 = arith.constant 0.000000e+00 : f32
    %16 = vector.broadcast %cst_12 : f32 to vector<8x16xf32>
    %17 = arith.cmpf ogt, %15, %16 : vector<8x16xf32>
    %cst_13 = arith.constant 0.00999999977 : f32
    %18 = vector.broadcast %cst_13 : f32 to vector<8x16xf32>
    %19 = arith.mulf %18, %15 : vector<8x16xf32>
    %20 = arith.select %17, %15, %19 : vector<8x16xi1>, vector<8x16xf32>
    %c0_14 = arith.constant 0 : index
    %c0_15 = arith.constant 0 : index
    %21 = vector.load %arg6[%c0_14, %c0_15] : memref<16x1xf32, #tpu.memory_space<vmem>>, vector<16x1xf32>
    %cst_16 = arith.constant dense<0.000000e+00> : vector<8x1xf32>
    %22 = tpu.matmul %20, %21, %cst_16 {dimension_numbers = #tpu.dot_dimension_numbers<[1], [0], [0], [1], [0, 0, 1, 1], [], []>} : vector<8x16xf32>, vector<16x1xf32>, vector<8x1xf32> -> vector<8x1xf32>
    %c0_17 = arith.constant 0 : index
    %c0_18 = arith.constant 0 : index
    %23 = vector.load %arg7[%c0_17, %c0_18] : memref<1x1xf32, #tpu.memory_space<vmem>>, vector<1x1xf32>
    %24 = vector.broadcast %23 : vector<1x1xf32> to vector<8x1xf32>
    %25 = arith.addf %22, %24 : vector<8x1xf32>
    %cst_19 = arith.constant 0.000000e+00 : f32
    %26 = vector.broadcast %cst_19 : f32 to vector<8x1xf32>
    %27 = arith.subf %26, %25 : vector<8x1xf32>
    %28 = math.exp %27 : vector<8x1xf32>
    %cst_20 = arith.constant 1.000000e+00 : f32
    %29 = vector.broadcast %cst_20 : f32 to vector<8x1xf32>
    %30 = arith.addf %29, %28 : vector<8x1xf32>
    %cst_21 = arith.constant 1.000000e+00 : f32
    %31 = vector.broadcast %cst_21 : f32 to vector<8x1xf32>
    %32 = arith.divf %31, %30 : vector<8x1xf32>
    %cst_22 = arith.constant 1.000000e+00 : f32
    %33 = vector.broadcast %cst_22 : f32 to vector<8x1xf32>
    %34 = arith.subf %33, %32 : vector<8x1xf32>
    %35 = tpu.iota {dimensions = array<i32: 1>} : vector<8x2xi32>
    %c0_i32 = arith.constant 0 : i32
    %36 = vector.broadcast %c0_i32 : i32 to vector<8x2xi32>
    %37 = arith.cmpi eq, %35, %36 : vector<8x2xi32>
    %38 = vector.shape_cast %34 : vector<8x1xf32> to vector<8x1xf32>
    %39 = vector.broadcast %38 : vector<8x1xf32> to vector<8x2xf32>
    %40 = vector.shape_cast %32 : vector<8x1xf32> to vector<8x1xf32>
    %41 = vector.broadcast %40 : vector<8x1xf32> to vector<8x2xf32>
    %42 = arith.select %37, %39, %41 : vector<8x2xi1>, vector<8x2xf32>
    %c0_23 = arith.constant 0 : index
    %c0_24 = arith.constant 0 : index
    %43 = vector.load %arg8[%c0_23, %c0_24] : memref<8x2xf32, #tpu.memory_space<vmem>>, vector<8x2xf32>
    tpu.vector_store %arg8[%c0_23, %c0_24], %42 {strides = array<i32>} : memref<8x2xf32, #tpu.memory_space<vmem>>, vector<8x2xf32>,
    return
  }
  func.func @transform_0(%arg0: i32) -> (i32, i32) {
    %c0_i32 = arith.constant 0 : i32
    %c0_i32_0 = arith.constant 0 : i32
    return %arg0, %c0_i32 : i32, i32
  }
  func.func @transform_1(%arg0: i32) -> (i32, i32) {
    %c0_i32 = arith.constant 0 : i32
    %c0_i32_0 = arith.constant 0 : i32
    %c0_i32_1 = arith.constant 0 : i32
    return %c0_i32, %c0_i32_0 : i32, i32
  }
  func.func @transform_2(%arg0: i32) -> (i32, i32) {
    %c0_i32 = arith.constant 0 : i32
    %c0_i32_0 = arith.constant 0 : i32
    %c0_i32_1 = arith.constant 0 : i32
    return %c0_i32, %c0_i32_0 : i32, i32
  }
  func.func @transform_3(%arg0: i32) -> (i32, i32) {
    %c0_i32 = arith.constant 0 : i32
    %c0_i32_0 = arith.constant 0 : i32
    %c0_i32_1 = arith.constant 0 : i32
    return %c0_i32, %c0_i32_0 : i32, i32
  }
  func.func @transform_4(%arg0: i32) -> (i32, i32) {
    %c0_i32 = arith.constant 0 : i32
    %c0_i32_0 = arith.constant 0 : i32
    %c0_i32_1 = arith.constant 0 : i32
    return %c0_i32, %c0_i32_0 : i32, i32
  }
  func.func @transform_5(%arg0: i32) -> (i32, i32) {
    %c0_i32 = arith.constant 0 : i32
    %c0_i32_0 = arith.constant 0 : i32
    %c0_i32_1 = arith.constant 0 : i32
    return %c0_i32, %c0_i32_0 : i32, i32
  }
  func.func @transform_6(%arg0: i32) -> (i32, i32) {
    %c0_i32 = arith.constant 0 : i32
    %c0_i32_0 = arith.constant 0 : i32
    %c0_i32_1 = arith.constant 0 : i32
    return %c0_i32, %c0_i32_0 : i32, i32
  }
  func.func @transform_7(%arg0: i32) -> (i32, i32) {
    %c0_i32 = arith.constant 0 : i32
    %c0_i32_0 = arith.constant 0 : i32
    return %arg0, %c0_i32 : i32, i32
  }
}

</mosaic_0001>

<bundles_post_ra>
// kernel: tpu_custom_call.1
= control target key start
LH: loop header
LB: loop body
LE: loop exit
PB: predicated region body
PF: predicated region fallthrough
CT: control target
= control target key end

     0   :  { %v409_v0 = vmov 0.0|0.0   ;;  %vm410_vm0 = vmmov 0   ;;  %v411_v4 = vmov 0.0   ;;  %vm40_vm1 = vcmask 261120   ;;  %s513_s1 = inlined_call_operand.vmem [shape: f32[32,64], index: 1, kind: input, shape index: {}]   ;;  %s514_s3 = inlined_call_operand.vmem [shape: f32[64,16], index: 3, kind: input, shape index: {}]   ;;  %s515_s0 = inlined_call_operand.vmem [shape: f32[8,32], index: 0, kind: input, shape index: {}]   ;;  %s516_s2 = inlined_call_operand.vmem [shape: f32[1,64], index: 2, kind: input, shape index: {}]   ;;  %s517_s5 = inlined_call_operand.vmem [shape: f32[16,1], index: 5, kind: input, shape index: {}]   ;;  %s518_s6 = inlined_call_operand.<no memory space> [shape: f32[1,1], index: 6, kind: input, shape index: {}]   ;;  %s519_s4 = inlined_call_operand.vmem [shape: f32[1,16], index: 4, kind: input, shape index: {}]   ;;  %s520_s7 = inlined_call_operand.vmem [shape: f32[8,2], index: 7, kind: output, shape index: {}]  }
   0x1   :  { %379 = vmatprep.subr.bf16.mxu0 %v409_v0  ;;  %v29_v1 = vld [vmem:[%s513_s1] sm:$0xff]  ;;  %v30_v2 = vld [vmem:[%s513_s1 + $0x8] sm:$0xff]  ;;  %v31_v3 = vld [vmem:[%s513_s1 + $0x10] sm:$0xff]  ;;  %350 = vmatprep.mubr.msk.f32.mxu0 %vm410_vm0, %v411_v4  ;;  %vm132_vm3 = vcmask 523264   ;;  %v12_v30 = vstv %s518_s6  ;;  %vm218_vm5 = vcmask 130048   ;;  %v412_v37 = vmov 0  }
   0x2   :  { %v380_v5 = vpack.c.bf16 %v30_v2, %v29_v1  ;;  %v32_v6 = vld [vmem:[%s513_s1 + $0x18] sm:$0xff]  ;;  %385 = vmatprep.subr.bf16.mxu1 %v409_v0  ;;  %v117_v7 = vld [vmem:[%s514_s3] sm:$0xff]  ;;  %369 = vmatprep.mubr.msk.f32.mxu1 %vm410_vm0, %v411_v4  ;;  %v118_v8 = vld [vmem:[%s514_s3 + $0x8] sm:$0xff]  ;;  %13 = vst [vmem:[#allocation2] sm:$0x1] %v12_v30  ;;  %v299_v48 = vlaneseq  ;;  %vm313_vm7 = vcmask 15360  }
   0x3   :  { %v119_v9 = vld [vmem:[%s514_s3 + $0x10] sm:$0xff]  ;;  %v120_v10 = vld [vmem:[%s514_s3 + $0x18] sm:$0xff]  ;;  %v383_v11 = vpack.c.bf16 %v32_v6, %v31_v3  ;;  %v386_v12 = vpack.c.bf16 %v118_v8, %v117_v7  ;;  %v121_v14 = vld [vmem:[%s514_s3 + $0x20] sm:$0xff]  ;;  %404 = vset.pattern.permute.xlu0 %v412_v37 }
   0x4   :  { %381 = vmatpush3.bf16.msra.mxu0 %v380_v5  ;;  %v389_v13 = vpack.c.bf16 %v120_v10, %v119_v9  ;;  %v122_v15 = vld [vmem:[%s514_s3 + $0x28] sm:$0xff]  ;;  %v28_v16 = vld [vmem:[%s515_s0] sm:$0xff]  ;;  %v123_v18 = vld [vmem:[%s514_s3 + $0x30] sm:$0xff]  ;;  %v300_v49 = vand.u32 127, %v299_v48 }
   0x5   :  { %382 = vmatprep.subr.bf16.mxu0 %v409_v0  ;;  %387 = vmatpush3.bf16.msra.mxu1 %v386_v12  ;;  %v392_v17 = vpack.c.bf16 %v122_v15, %v121_v14  ;;  %v124_v19 = vld [vmem:[%s514_s3 + $0x38] sm:$0xff]  ;;  %v319_v21 = vld [vmem:[%s516_s2] ss:$0 sm:$0xff]  ;;  %v210_v28 = vld [vmem:[%s517_s5 + $0x8] sm:$0xff] }
   0x6   :  { %388 = vmatprep.subr.bf16.mxu1 %v409_v0  ;;  %v395_v20 = vpack.c.bf16 %v124_v19, %v123_v18  ;;  %v209_v27 = vld [vmem:[%s517_s5] sm:$0xff]  ;;  %vm301_vm6 = vcmp.eq.s32.totalorder %v300_v49, 0 }
   0x7   :  { %v398_v29 = vpack.c.bf16 %v210_v28, %v209_v27  ;;  %v321_v31 = vld [vmem:[%s519_s4] ss:$0 sm:$0xff] }
   0x8   :  { %384 = vmatpush3.bf16.msra.mxu0 %v383_v11 }
   0x9   :  { %397 = vmatprep.subr.bf16.mxu0 %v409_v0  ;;  %390 = vmatpush3.bf16.msra.mxu1 %v389_v13  ;;  %v323_v38 = vld [vmem:[#allocation2] ss:$0 sm:$0xff] }
   0xa   :  { %391 = vmatprep.subr.bf16.mxu1 %v409_v0 }
   0xb   :  { %351 = vmatmul.mubr.msk.f32.vlgmr.msra.gmra.mrb[0].mxu0 %vm40_vm1, %v28_v16 }
   0xc   :  { %376 = vmatprep.mubr.msk.f32.mxu0 %vm410_vm0, %v411_v4  ;;  %399 = vmatpush3.bf16.msra.mxu0 %v398_v29 }
   0xd   :  { %393 = vmatpush3.bf16.msra.mxu1 %v392_v17 }
   0xe   :  { %394 = vmatprep.subr.bf16.mxu1 %v409_v0 }
  0x11   :  { %396 = vmatpush3.bf16.msra.mxu1 %v395_v20 }
  0xde   :  { %v110_v22 = vpop.f32.mrb[0].mxu0 }
  0xdf   :  { %v111_v23 = vadd.f32 %v319_v21, %v110_v22  ;;  %v352_v24 = vpop.f32.mrb[1].mxu0 }
  0xe1   :  { %vm114_vm2 = vcmp.gt.f32.partialorder %v111_v23, 0.0  ;;  %v115_v25 = vmul.f32 0.01, %v111_v23 }
  0xe3   :  { %v116_v26 = vsel %vm114_vm2, %v111_v23, %v115_v25 }
  0xe4   :  { %370 = vmatmul.mubr.msk.f32.vlgmr.msra.gmra.mrb[0].mxu1 %vm132_vm3, %v116_v26 }
 0x1b7   :  { %v202_v32 = vpop.f32.mrb[0].mxu1 }
 0x1b8   :  { %v203_v33 = vadd.f32 %v321_v31, %v202_v32  ;;  %v371_v34 = vpop.f32.mrb[1].mxu1 }
 0x1ba   :  { %vm206_vm4 = vcmp.gt.f32.partialorder %v203_v33, 0.0  ;;  %v207_v35 = vmul.f32 0.01, %v203_v33 }
 0x1bc   :  { %v208_v36 = vsel %vm206_vm4, %v203_v33, %v207_v35 }
 0x1bd   :  { %377 = vmatmul.mubr.msk.f32.vlgmr.msra.gmra.mrb[2].mxu0 %vm218_vm5, %v208_v36 }
 0x290   :  { %v288_v39 = vpop.f32.mrb[2].mxu0 }
 0x291   :  { %v289_v40 = vadd.f32 %v323_v38, %v288_v39  ;;  %v378_v41 = vpop.f32.mrb[3].mxu0 }
 0x293   :  { %v292_v42 = vsub.f32 0.0, %v289_v40 }
 0x295   :  { %v293_v43 = vmul.f32 1.442695, %v292_v42 }
 0x297   :  { %405 = vpow2.f32 %v293_v43 }
 0x2a1   :  { %v406_v44 = vpop.eup %405 }
 0x2a2   :  { %v295_v45 = vadd.f32 1.0, %v406_v44 }
 0x2a4   :  { %407 = vrcp.f32 %v295_v45 }
 0x2ae   :  { %v408_v46 = vpop.eup %407 }
 0x2af   :  { %v298_v47 = vsub.f32 1.0, %v408_v46 }
 0x2b1   :  { %304 = vperm.xlu0 %404, %v298_v47  }
 0x2b5   :  { %309 = vperm.xlu0 %404, %v408_v46  }
 0x330   :  { %v305_v50 = vpop.permute.xlu0 %304 }
 0x334   :  { %v310_v51 = vpop.permute.xlu0 %309 }
 0x335   :  { %v312_v52 = vsel %vm301_vm6, %v305_v50, %v310_v51 }
 0x336   :  { %314 = vst.msk [vmem:[%s520_s7] sm:$0xff] %vm313_vm7, %v312_v52 }

</bundles_post_ra>
